<compile_context>
chip_gen: v6e
topology: v6e:2x2x1
jax: 0.10.0
libtpu: 0.0.40
codegen_flags: <defaults>
</compile_context>

<pallas_src>
import math

import jax
import jax.numpy as jnp
from jax.experimental import pallas as pl
from jax.experimental.pallas import tpu as pltpu


def _round_up(x, m):
    return ((x + m - 1) // m) * m


def seq2seq_kernel(act_ref, wcat_ref, misc_ref, out_ref):
    """One fused step of the 2-layer LSTM + Linear(E, 1).

    act_ref  : (Bt, 5*H) f32   lanes = [x | h0_l0 | h0_l1 | c0_l0 | c0_l1]
    wcat_ref : (2, 2*H, 4*H)   fused [W_ih^T ; W_hh^T], gate order [i,f,g,o],
               g-block pre-scaled by 2 (sigmoid-only gate trick)
    misc_ref : (4, 4*H) f32    rows = [b_l0, b_l1, w_lin (first H lanes), b_lin bcast]
    out_ref  : (Bt, 5*H) f32   lanes = [h1 | h2 | c1 | c2 | out broadcast]
    """
    H = act_ref.shape[1] // 5
    cdt = wcat_ref.dtype

    def cell(xh, c, layer):
        gates = jnp.dot(xh.astype(cdt), wcat_ref[layer],
                        preferred_element_type=jnp.float32)
        gates = gates + misc_ref[layer:layer + 1, :]            # (Bt, 4H) f32
        s = jax.nn.sigmoid(gates)                               # single EUP pass
        i = s[:, 0 * H:1 * H]
        f = s[:, 1 * H:2 * H]
        g = 2.0 * s[:, 2 * H:3 * H] - 1.0                       # tanh(x) = 2*sigmoid(2x) - 1
        o = s[:, 3 * H:4 * H]
        c_new = f * c + i * g
        h_new = o * jnp.tanh(c_new)
        return h_new, c_new

    # ---- layer 0: [x | h0_l0] is already contiguous in the input slab ----
    h1, c1 = cell(act_ref[:, 0:2 * H], act_ref[:, 3 * H:4 * H], 0)

    # ---- layer 1 (input = layer-0 output; no dropout at inference) ----
    xh1 = jnp.concatenate([h1, act_ref[:, 2 * H:3 * H]], axis=-1)   # two 128-aligned halves
    h2, c2 = cell(xh1, act_ref[:, 4 * H:5 * H], 1)

    # ---- Linear(E, 1) on VPU/XLU: broadcast multiply + lane reduce ----
    w_lin = misc_ref[2:3, 0:H]                                  # (1, H)
    b_lin = misc_ref[3:4, 0:H]                                  # (1, H), b_lin in every lane
    proj = jnp.sum(h2 * w_lin, axis=-1, keepdims=True)          # (Bt, 1)

    # lane-dense, 128-aligned stores into a single output slab
    out_ref[:, 0 * H:1 * H] = h1
    out_ref[:, 1 * H:2 * H] = h2
    out_ref[:, 2 * H:3 * H] = c1
    out_ref[:, 3 * H:4 * H] = c2
    out_ref[:, 4 * H:5 * H] = proj + b_lin                      # batch stays on sublanes


def init_params(key, embed_dim):
    """Raw torch-layout parameters, U(-1/sqrt(H), 1/sqrt(H)) like torch."""
    E = embed_dim
    bound = 1.0 / math.sqrt(E)
    keys = jax.random.split(key, 10)

    def u(k, shape):
        return jax.random.uniform(k, shape, jnp.float32, -bound, bound)

    layers = []
    ki = 0
    for _ in range(2):
        w_ih = u(keys[ki], (4 * E, E)); ki += 1      # torch weight_ih_l{l}
        w_hh = u(keys[ki], (4 * E, E)); ki += 1      # torch weight_hh_l{l}
        b_ih = u(keys[ki], (4 * E,)); ki += 1
        b_hh = u(keys[ki], (4 * E,)); ki += 1
        layers.append((w_ih, w_hh, b_ih, b_hh))
    w_lin = u(keys[ki], (1, E)); ki += 1             # torch Linear(E, 1).weight
    b_lin = u(keys[ki], (1,)); ki += 1
    return (layers[0], layers[1], (w_lin, b_lin))


def pack_params(params, compute_dtype=jnp.float32):
    """Pack raw torch-layout params into the kernel's lane-padded fused layout.

    Per layer:  W_cat = [W_ih^T ; W_hh^T] zero-padded to (2*Ep, 4*Ep), gate order
                [i, f, g, o] with the g block (weights AND bias) pre-scaled by 2
                so the kernel only needs sigmoid.
    misc rows:  [bias_l0, bias_l1, w_lin (padded), b_lin broadcast].
    """
    (l0, l1, (w_lin, b_lin)) = params
    E = w_lin.shape[1]
    Ep = _round_up(E, 128)

    def pack_layer(w_ih, w_hh, b_ih, b_hh):
        w = jnp.zeros((2 * Ep, 4 * Ep), jnp.float32)
        b = jnp.zeros((4 * Ep,), jnp.float32)
        for k, scale in enumerate((1.0, 1.0, 2.0, 1.0)):   # i, f, g(x2), o
            w = w.at[0:E, k * Ep:k * Ep + E].set(w_ih[k * E:(k + 1) * E, :].T * scale)
            w = w.at[Ep:Ep + E, k * Ep:k * Ep + E].set(w_hh[k * E:(k + 1) * E, :].T * scale)
            b = b.at[k * Ep:k * Ep + E].set(
                (b_ih[k * E:(k + 1) * E] + b_hh[k * E:(k + 1) * E]) * scale)
        return w, b

    w0, b0 = pack_layer(*l0)
    w1, b1 = pack_layer(*l1)
    wcat = jnp.stack([w0, w1]).astype(compute_dtype)            # (2, 2Ep, 4Ep)
    misc = jnp.zeros((4, 4 * Ep), jnp.float32)
    misc = misc.at[0].set(b0).at[1].set(b1)
    misc = misc.at[2, 0:E].set(w_lin[0])
    misc = misc.at[3, :].set(b_lin[0])
    return wcat, misc


def seq2seq_layer(inputs, hidden, packed_params):
    """Forward matching seq2seqLayer.forward (eval mode).

    inputs : (B, E) float32
    hidden : None or (h0, c0), each (2, B, E)
    returns (outputs (B, 1, 1), (h_n (2, B, E), c_n (2, B, E)))
    """
    wcat, misc = packed_params
    B, E = inputs.shape
    Ep = wcat.shape[2] // 4
    Bt = min(256, _round_up(B, 8))          # batch tile, sublane-aligned
    Bp = _round_up(B, Bt)

    if hidden is None:
        # zero state costs no extra DMA: it's just the already-zero region of
        # the single input slab below.
        h0 = jnp.zeros((2, B, E), jnp.float32)
        c0 = jnp.zeros((2, B, E), jnp.float32)
    else:
        h0, c0 = hidden
        h0 = h0.astype(jnp.float32)
        c0 = c0.astype(jnp.float32)

    # single lane-dense input slab: [x | h0_l0 | h0_l1 | c0_l0 | c0_l1]
    act = jnp.zeros((Bp, 5 * Ep), jnp.float32)
    act = act.at[:B, 0:E].set(inputs.astype(jnp.float32))
    act = act.at[:B, 1 * Ep:1 * Ep + E].set(h0[0])
    act = act.at[:B, 2 * Ep:2 * Ep + E].set(h0[1])
    act = act.at[:B, 3 * Ep:3 * Ep + E].set(c0[0])
    act = act.at[:B, 4 * Ep:4 * Ep + E].set(c0[1])

    # explicit scoped-VMEM budget: v5e default is only 16 MiB; cap below v7x's
    # 64 MiB physical VMEM (headroom for double-buffering + compiler scratch).
    est = 2 * (wcat.size * wcat.dtype.itemsize
               + misc.size * 4
               + 2 * Bt * 5 * Ep * 4)
    vmem_limit = int(min(max(2 * est, 32 << 20), 56 << 20))

    out_slab = pl.pallas_call(
        seq2seq_kernel,
        out_shape=jax.ShapeDtypeStruct((Bp, 5 * Ep), jnp.float32),
        grid=(Bp // Bt,),
        in_specs=[
            pl.BlockSpec((Bt, 5 * Ep), lambda i: (i, 0)),
            pl.BlockSpec((2, 2 * Ep, 4 * Ep), lambda i: (0, 0, 0)),
            pl.BlockSpec((4, 4 * Ep), lambda i: (0, 0)),
        ],
        out_specs=pl.BlockSpec((Bt, 5 * Ep), lambda i: (i, 0)),
        compiler_params=pltpu.CompilerParams(
            dimension_semantics=("parallel",),   # batch tiles shard across v7x's 2 TCs
            vmem_limit_bytes=vmem_limit,
        ),
    )(act, wcat, misc)

    h_n = jnp.stack([out_slab[:B, 0:E], out_slab[:B, Ep:Ep + E]])
    c_n = jnp.stack([out_slab[:B, 2 * Ep:2 * Ep + E],
                     out_slab[:B, 3 * Ep:3 * Ep + E]])
    outputs = out_slab[:B, 4 * Ep:4 * Ep + 1].reshape(B, 1, 1)
    return outputs, (h_n, c_n)


def _reference(inputs, hidden, params):
    """Pure-JAX reference of the PyTorch forward (eval mode), torch weight layout."""
    B, E = inputs.shape
    (l0, l1, (w_lin, b_lin)) = params
    if hidden is None:
        h0 = jnp.zeros((2, B, E), jnp.float32)
        c0 = jnp.zeros((2, B, E), jnp.float32)
    else:
        h0, c0 = hidden

    def cell(x, h, c, w_ih, w_hh, b_ih, b_hh):
        g = x @ w_ih.T + h @ w_hh.T + b_ih + b_hh
        i = jax.nn.sigmoid(g[:, 0 * E:1 * E])
        f = jax.nn.sigmoid(g[:, 1 * E:2 * E])
        gg = jnp.tanh(g[:, 2 * E:3 * E])
        o = jax.nn.sigmoid(g[:, 3 * E:4 * E])
        c_new = f * c + i * gg
        return o * jnp.tanh(c_new), c_new

    h1, c1 = cell(inputs, h0[0], c0[0], *l0)
    h2, c2 = cell(h1, h0[1], c0[1], *l1)
    out = (h2 @ w_lin.T + b_lin).reshape(B, 1, 1)
    return out, (jnp.stack([h1, h2]), jnp.stack([c1, c2]))


if __name__ == "__main__":
    B, E = 4, 32   # batch, embed_dim (== hidden_dim in the module)

    key = jax.random.PRNGKey(0)
    k_x, k_h, k_c, k_p = jax.random.split(key, 4)

    x = jax.random.normal(k_x, (B, E), jnp.float32)
    params = init_params(k_p, E)
    packed_f32 = pack_params(params, compute_dtype=jnp.float32)   # default: safe on v5e

    # case 1: hidden is None
    out1, (h1, c1) = seq2seq_layer(x, None, packed_f32)
    jax.block_until_ready((out1, h1, c1))

    # case 2: explicit hidden state
    h_in = jax.random.normal(k_h, (2, B, E), jnp.float32)
    c_in = jax.random.normal(k_c, (2, B, E), jnp.float32)
    out2, (h2, c2) = seq2seq_layer(x, (h_in, c_in), packed_f32)
    jax.block_until_ready((out2, h2, c2))

    # case 3: bf16 matmul operands (v6e/v7x path; keep f32 on v5e)
    packed_bf16 = pack_params(params, compute_dtype=jnp.bfloat16)
    out3, (h3, c3) = seq2seq_layer(x, (h_in, c_in), packed_bf16)
    jax.block_until_ready((out3, h3, c3))

    # sanity-check against a pure-JAX reference of the torch forward
    ro1, (rh1, rc1) = _reference(x, None, params)
    ro2, (rh2, rc2) = _reference(x, (h_in, c_in), params)
    assert jnp.allclose(out1, ro1, atol=1e-4)
    assert jnp.allclose(h1, rh1, atol=1e-4) and jnp.allclose(c1, rc1, atol=1e-4)
    assert jnp.allclose(out2, ro2, atol=1e-4)
    assert jnp.allclose(h2, rh2, atol=1e-4) and jnp.allclose(c2, rc2, atol=1e-4)
    assert jnp.allclose(out3, ro2, atol=1e-1, rtol=1e-1)          # bf16, loose
    assert jnp.allclose(h3, rh2, atol=1e-1) and jnp.allclose(c3, rc2, atol=1e-1)
    assert out1.shape == (B, 1, 1) and h1.shape == (2, B, E) and c1.shape == (2, B, E)

    print("KERNEL_OK")
</pallas_src>

<mosaic_0001>
module attributes {stable_mosaic.version = 11 : i64} {
  func.func @seq2seq_kernel(%arg0: i32, %arg1: memref<8x640xf32, #tpu.memory_space<vmem>>, %arg2: memref<2x256x512xf32, #tpu.memory_space<vmem>>, %arg3: memref<4x512xf32, #tpu.memory_space<vmem>>, %arg4: memref<8x640xf32, #tpu.memory_space<vmem>>) attributes {dimension_semantics = [#tpu.dimension_semantics<parallel>], iteration_bounds = array<i64: 1>, scalar_prefetch = 0 : i64, scratch_operands = 0 : i64, tpu.core_type = #tpu.core_type<tc>, window_params = [{transform_indices = @transform_0, window_bounds = array<i64: 8, 640>}, {pipeline_mode = #tpu.pipeline_mode<synchronous>, transform_indices = @transform_1, window_bounds = array<i64: 2, 256, 512>}, {pipeline_mode = #tpu.pipeline_mode<synchronous>, transform_indices = @transform_2, window_bounds = array<i64: 4, 512>}, {transform_indices = @transform_3, window_bounds = array<i64: 8, 640>}]} {
    %c0 = arith.constant 0 : index
    %c0_0 = arith.constant 0 : index
    %0 = vector.load %arg1[%c0, %c0_0] : memref<8x640xf32, #tpu.memory_space<vmem>>, vector<8x256xf32>
    %c0_1 = arith.constant 0 : index
    %c384 = arith.constant 384 : index
    %1 = vector.load %arg1[%c0_1, %c384] : memref<8x640xf32, #tpu.memory_space<vmem>>, vector<8x128xf32>
    %c0_2 = arith.constant 0 : index
    %c0_3 = arith.constant 0 : index
    %c0_4 = arith.constant 0 : index
    %2 = vector.load %arg2[%c0_2, %c0_3, %c0_4] : memref<2x256x512xf32, #tpu.memory_space<vmem>>, vector<1x256x512xf32>
    %3 = vector.shape_cast %2 : vector<1x256x512xf32> to vector<256x512xf32>
    %cst = arith.constant dense<0.000000e+00> : vector<8x512xf32>
    %4 = tpu.matmul %0, %3, %cst {dimension_numbers = #tpu.dot_dimension_numbers<[1], [0], [0], [1], [0, 0, 1, 1], [], []>} : vector<8x256xf32>, vector<256x512xf32>, vector<8x512xf32> -> vector<8x512xf32>
    %c0_5 = arith.constant 0 : index
    %c0_6 = arith.constant 0 : index
    %5 = vector.load %arg3[%c0_5, %c0_6] : memref<4x512xf32, #tpu.memory_space<vmem>>, vector<1x512xf32>
    %6 = vector.broadcast %5 : vector<1x512xf32> to vector<8x512xf32>
    %7 = arith.addf %4, %6 : vector<8x512xf32>
    %8 = arith.negf %7 : vector<8x512xf32>
    %9 = math.exp %8 : vector<8x512xf32>
    %cst_7 = arith.constant 1.000000e+00 : f32
    %10 = vector.broadcast %cst_7 : f32 to vector<8x512xf32>
    %11 = arith.addf %10, %9 : vector<8x512xf32>
    %12 = arith.divf %10, %11 : vector<8x512xf32>
    %13 = vector.extract_strided_slice %12 {offsets = [0, 0], sizes = [8, 128], strides = [1, 1]} : vector<8x512xf32> to vector<8x128xf32>
    %14 = vector.extract_strided_slice %12 {offsets = [0, 128], sizes = [8, 128], strides = [1, 1]} : vector<8x512xf32> to vector<8x128xf32>
    %15 = vector.extract_strided_slice %12 {offsets = [0, 256], sizes = [8, 128], strides = [1, 1]} : vector<8x512xf32> to vector<8x128xf32>
    %cst_8 = arith.constant 2.000000e+00 : f32
    %16 = vector.broadcast %cst_8 : f32 to vector<8x128xf32>
    %17 = arith.mulf %16, %15 : vector<8x128xf32>
    %cst_9 = arith.constant 1.000000e+00 : f32
    %18 = vector.broadcast %cst_9 : f32 to vector<8x128xf32>
    %19 = arith.subf %17, %18 : vector<8x128xf32>
    %20 = vector.extract_strided_slice %12 {offsets = [0, 384], sizes = [8, 128], strides = [1, 1]} : vector<8x512xf32> to vector<8x128xf32>
    %21 = arith.mulf %14, %1 : vector<8x128xf32>
    %22 = arith.mulf %13, %19 : vector<8x128xf32>
    %23 = arith.addf %21, %22 : vector<8x128xf32>
    %24 = math.tanh %23 : vector<8x128xf32>
    %25 = arith.mulf %20, %24 : vector<8x128xf32>
    %c0_10 = arith.constant 0 : index
    %c256 = arith.constant 256 : index
    %26 = vector.load %arg1[%c0_10, %c256] : memref<8x640xf32, #tpu.memory_space<vmem>>, vector<8x128xf32>
    %27 = tpu.concatenate %25, %26 in 1 : vector<8x128xf32>, vector<8x128xf32> -> vector<8x256xf32>
    %c0_11 = arith.constant 0 : index
    %c512 = arith.constant 512 : index
    %28 = vector.load %arg1[%c0_11, %c512] : memref<8x640xf32, #tpu.memory_space<vmem>>, vector<8x128xf32>
    %c1 = arith.constant 1 : index
    %c0_12 = arith.constant 0 : index
    %c0_13 = arith.constant 0 : index
    %29 = vector.load %arg2[%c1, %c0_12, %c0_13] : memref<2x256x512xf32, #tpu.memory_space<vmem>>, vector<1x256x512xf32>
    %30 = vector.shape_cast %29 : vector<1x256x512xf32> to vector<256x512xf32>
    %cst_14 = arith.constant dense<0.000000e+00> : vector<8x512xf32>
    %31 = tpu.matmul %27, %30, %cst_14 {dimension_numbers = #tpu.dot_dimension_numbers<[1], [0], [0], [1], [0, 0, 1, 1], [], []>} : vector<8x256xf32>, vector<256x512xf32>, vector<8x512xf32> -> vector<8x512xf32>
    %c1_15 = arith.constant 1 : index
    %c0_16 = arith.constant 0 : index
    %32 = vector.load %arg3[%c1_15, %c0_16] : memref<4x512xf32, #tpu.memory_space<vmem>>, vector<1x512xf32>
    %33 = vector.broadcast %32 : vector<1x512xf32> to vector<8x512xf32>
    %34 = arith.addf %31, %33 : vector<8x512xf32>
    %35 = arith.negf %34 : vector<8x512xf32>
    %36 = math.exp %35 : vector<8x512xf32>
    %cst_17 = arith.constant 1.000000e+00 : f32
    %37 = vector.broadcast %cst_17 : f32 to vector<8x512xf32>
    %38 = arith.addf %37, %36 : vector<8x512xf32>
    %39 = arith.divf %37, %38 : vector<8x512xf32>
    %40 = vector.extract_strided_slice %39 {offsets = [0, 0], sizes = [8, 128], strides = [1, 1]} : vector<8x512xf32> to vector<8x128xf32>
    %41 = vector.extract_strided_slice %39 {offsets = [0, 128], sizes = [8, 128], strides = [1, 1]} : vector<8x512xf32> to vector<8x128xf32>
    %42 = vector.extract_strided_slice %39 {offsets = [0, 256], sizes = [8, 128], strides = [1, 1]} : vector<8x512xf32> to vector<8x128xf32>
    %cst_18 = arith.constant 2.000000e+00 : f32
    %43 = vector.broadcast %cst_18 : f32 to vector<8x128xf32>
    %44 = arith.mulf %43, %42 : vector<8x128xf32>
    %cst_19 = arith.constant 1.000000e+00 : f32
    %45 = vector.broadcast %cst_19 : f32 to vector<8x128xf32>
    %46 = arith.subf %44, %45 : vector<8x128xf32>
    %47 = vector.extract_strided_slice %39 {offsets = [0, 384], sizes = [8, 128], strides = [1, 1]} : vector<8x512xf32> to vector<8x128xf32>
    %48 = arith.mulf %41, %28 : vector<8x128xf32>
    %49 = arith.mulf %40, %46 : vector<8x128xf32>
    %50 = arith.addf %48, %49 : vector<8x128xf32>
    %51 = math.tanh %50 : vector<8x128xf32>
    %52 = arith.mulf %47, %51 : vector<8x128xf32>
    %c2 = arith.constant 2 : index
    %c0_20 = arith.constant 0 : index
    %53 = vector.load %arg3[%c2, %c0_20] : memref<4x512xf32, #tpu.memory_space<vmem>>, vector<1x128xf32>
    %c3 = arith.constant 3 : index
    %c0_21 = arith.constant 0 : index
    %54 = vector.load %arg3[%c3, %c0_21] : memref<4x512xf32, #tpu.memory_space<vmem>>, vector<1x128xf32>
    %55 = vector.broadcast %53 : vector<1x128xf32> to vector<8x128xf32>
    %56 = arith.mulf %52, %55 : vector<8x128xf32>
    %cst_22 = arith.constant dense<0.000000e+00> : vector<8xf32>
    %57 = vector.multi_reduction <add>, %56, %cst_22 [1] : vector<8x128xf32> to vector<8xf32>
    %58 = vector.shape_cast %57 : vector<8xf32> to vector<8x1xf32>
    %c0_23 = arith.constant 0 : index
    %c0_24 = arith.constant 0 : index
    %59 = vector.load %arg4[%c0_23, %c0_24] : memref<8x640xf32, #tpu.memory_space<vmem>>, vector<8x128xf32>
    tpu.vector_store %arg4[%c0_23, %c0_24], %25 {strides = array<i32>} : memref<8x640xf32, #tpu.memory_space<vmem>>, vector<8x128xf32>,
    %c0_25 = arith.constant 0 : index
    %c128 = arith.constant 128 : index
    %60 = vector.load %arg4[%c0_25, %c128] : memref<8x640xf32, #tpu.memory_space<vmem>>, vector<8x128xf32>
    tpu.vector_store %arg4[%c0_25, %c128], %52 {strides = array<i32>} : memref<8x640xf32, #tpu.memory_space<vmem>>, vector<8x128xf32>,
    %c0_26 = arith.constant 0 : index
    %c256_27 = arith.constant 256 : index
    %61 = vector.load %arg4[%c0_26, %c256_27] : memref<8x640xf32, #tpu.memory_space<vmem>>, vector<8x128xf32>
    tpu.vector_store %arg4[%c0_26, %c256_27], %23 {strides = array<i32>} : memref<8x640xf32, #tpu.memory_space<vmem>>, vector<8x128xf32>,
    %c0_28 = arith.constant 0 : index
    %c384_29 = arith.constant 384 : index
    %62 = vector.load %arg4[%c0_28, %c384_29] : memref<8x640xf32, #tpu.memory_space<vmem>>, vector<8x128xf32>
    tpu.vector_store %arg4[%c0_28, %c384_29], %50 {strides = array<i32>} : memref<8x640xf32, #tpu.memory_space<vmem>>, vector<8x128xf32>,
    %63 = vector.broadcast %58 : vector<8x1xf32> to vector<8x128xf32>
    %64 = vector.broadcast %54 : vector<1x128xf32> to vector<8x128xf32>
    %65 = arith.addf %63, %64 : vector<8x128xf32>
    %c0_30 = arith.constant 0 : index
    %c512_31 = arith.constant 512 : index
    %66 = vector.load %arg4[%c0_30, %c512_31] : memref<8x640xf32, #tpu.memory_space<vmem>>, vector<8x128xf32>
    tpu.vector_store %arg4[%c0_30, %c512_31], %65 {strides = array<i32>} : memref<8x640xf32, #tpu.memory_space<vmem>>, vector<8x128xf32>,
    return
  }
  func.func @transform_0(%arg0: i32) -> (i32, i32) {
    %c0_i32 = arith.constant 0 : i32
    %c0_i32_0 = arith.constant 0 : i32
    return %arg0, %c0_i32 : i32, i32
  }
  func.func @transform_1(%arg0: i32) -> (i32, i32, i32) {
    %c0_i32 = arith.constant 0 : i32
    %c0_i32_0 = arith.constant 0 : i32
    %c0_i32_1 = arith.constant 0 : i32
    %c0_i32_2 = arith.constant 0 : i32
    return %c0_i32, %c0_i32_0, %c0_i32_1 : i32, i32, i32
  }
  func.func @transform_2(%arg0: i32) -> (i32, i32) {
    %c0_i32 = arith.constant 0 : i32
    %c0_i32_0 = arith.constant 0 : i32
    %c0_i32_1 = arith.constant 0 : i32
    return %c0_i32, %c0_i32_0 : i32, i32
  }
  func.func @transform_3(%arg0: i32) -> (i32, i32) {
    %c0_i32 = arith.constant 0 : i32
    %c0_i32_0 = arith.constant 0 : i32
    return %arg0, %c0_i32 : i32, i32
  }
}

</mosaic_0001>

<bundles_post_ra>
// kernel: tpu_custom_call.1
= control target key start
LH: loop header
LB: loop body
LE: loop exit
PB: predicated region body
PF: predicated region fallthrough
CT: control target
= control target key end

     0   :  { %8 = vsyncpa [#allocation3], 0  ;;  %s924_s0 = inlined_call_operand.hbm [shape: f32[8,640], index: 0, kind: input, shape index: {}]   ;;  %s925_s1 = inlined_call_operand.hbm [shape: f32[2,256,512], index: 1, kind: input, shape index: {}]   ;;  %s926_s2 = inlined_call_operand.hbm [shape: f32[4,512], index: 2, kind: input, shape index: {}]   ;;  %s927_s3 = inlined_call_operand.hbm [shape: f32[8,640], index: 3, kind: output, shape index: {}]  }
   0x1   :  { %9 = vsyncpa [#allocation6], 0 }
   0x2   :  { %10 = vsyncpa [#allocation4], 0  ;;  %s880_s12 = smov [#allocation5]  }
   0x3   :  { %s26_s13 = sshll.u32 %s880_s12, 4  ;;  %s27_s13 = int_to_ptr.vmem [resolvable:$true] %s26_s13 }
   0x4   :  { %s802_s14 = scalar_lea.vmem %s27_s13, 32768  ;;  %p807_p1 = scmp.lt.s32.totalorder %s27_s13, %s27_s13 }
   0x5   :  { %p803_p0 = scmp.ne.s32.totalorder %s27_s13, %s802_s14  ;;  %p808_p2 = scmp.lt.s32.totalorder %s802_s14, %s802_s14 }
   0x7   :  { %p809_p3 = por %p808_p2, %p807_p1 }
   0x9   :  { %p810_p4 = pnand %p809_p3, %p803_p0 }
   0xb   :  { %813 = shalt.err (!%p810_p4)
}
   0xc   :  { %s881_s15 = smov 512   ;;  %s882_s16 = smov 32  }
   0xd   :  { %32 = dma.hbm_to_vmem [thread:$0]  %s925_s1, 32768, %s27_s13, [#allocation6], %s881_s15, %s881_s15, %s882_s16  }
   0xe   :  { %s883_s19 = smov [#allocation2]   ;;  %s884_s21 = smov [#allocation7]  }
   0xf   :  { %s17_s20 = sshll.u32 %s883_s19, 4  ;;  %s39_s22 = sshll.u32 %s884_s21, 4  ;;  %s18_s20 = int_to_ptr.vmem [resolvable:$true] %s17_s20  ;;  %s40_s22 = int_to_ptr.vmem [resolvable:$true] %s39_s22 }
  0x10   :  { %s822_s23 = scalar_lea.vmem %s18_s20, 640  ;;  %p827_p6 = scmp.lt.s32.totalorder %s18_s20, %s18_s20 }
  0x11   :  { %p823_p5 = scmp.ne.s32.totalorder %s18_s20, %s822_s23  ;;  %p828_p7 = scmp.lt.s32.totalorder %s822_s23, %s822_s23 }
  0x13   :  { %p829_p8 = por %p828_p7, %p827_p6 }
  0x15   :  { %p830_p9 = pnand %p829_p8, %p823_p5 }
  0x17   :  { %833 = shalt.err (!%p830_p9)
}
  0x18   :  { %20 = dma.hbm_to_vmem [thread:$0]  %s924_s0, 640, %s18_s20, [#allocation3]  }
  0x19   :  { %s842_s26 = scalar_lea.vmem %s40_s22, 256  ;;  %p847_p11 = scmp.lt.s32.totalorder %s40_s22, %s40_s22 }
  0x1a   :  { %p843_p10 = scmp.ne.s32.totalorder %s40_s22, %s842_s26  ;;  %p848_p12 = scmp.lt.s32.totalorder %s842_s26, %s842_s26 }
  0x1c   :  { %p849_p13 = por %p848_p12, %p847_p11 }
  0x1e   :  { %p850_p0 = pnand %p849_p13, %p843_p10 }
  0x20   :  { %853 = shalt.err (!%p850_p0)
}
  0x21   :  { %42 = dma.hbm_to_vmem [thread:$0]  %s926_s2, 256, %s40_s22, [#allocation6]  }
  0x22   :  { %874 = dma.done.wait [#allocation3], 640  }
  0x23   :  { %875 = vsyncadd [#allocation3], 4294966656 }
  0x24   :  { %876 = dma.done.wait [#allocation6], 33024  }
  0x25   :  { %877 = vsyncadd [#allocation6], 4294934272  ;;  %v116_v0 = vld [vmem:[#allocation5 + $0x1e8] sm:$0xff]  ;;  %v118_v1 = vld [vmem:[#allocation5 + $0x1f8] sm:$0xff]  ;;  %s885_s0 = smov [#allocation8]  }
  0x26   :  { %v115_v2 = vld [vmem:[#allocation5 + $0x1e0] sm:$0xff]  ;;  %205 = vmatprep.subr.mxu0 %v116_v0  ;;  %276 = vmatprep.subr.mxu1 %v118_v1  ;;  %v117_v3 = vld [vmem:[#allocation5 + $0x1f0] sm:$0xff]  ;;  %v112_v4 = vld [vmem:[#allocation5 + $0x1c8] sm:$0xff]  ;;  %s730_s2 = sshll.u32 %s885_s0, 4  ;;  %s731_s2 = int_to_ptr.vmem [resolvable:$true] %s730_s2 }
  0x27   :  { %v114_v5 = vld [vmem:[#allocation5 + $0x1d8] sm:$0xff]  ;;  %206 = vmatpush1.msra.mxu0 %v115_v2  ;;  %277 = vmatpush1.msra.mxu1 %v117_v3  ;;  %v111_v6 = vld [vmem:[#allocation5 + $0x1c0] sm:$0xff]  ;;  %v113_v7 = vld [vmem:[#allocation5 + $0x1d0] sm:$0xff]  ;;  %s854_s28 = scalar_lea.vmem %s731_s2, 640  ;;  %p859_p2 = scmp.lt.s32.totalorder %s731_s2, %s731_s2 }
  0x28   :  { %v108_v8 = vld [vmem:[#allocation5 + $0x1a8] sm:$0xff]  ;;  %207 = vmatprep.subr.mxu0 %v112_v4  ;;  %278 = vmatprep.subr.mxu1 %v114_v5  ;;  %v110_v9 = vld [vmem:[#allocation5 + $0x1b8] sm:$0xff]  ;;  %v107_v10 = vld [vmem:[#allocation5 + $0x1a0] sm:$0xff]  ;;  %p855_p1 = scmp.ne.s32.totalorder %s731_s2, %s854_s28  ;;  %p860_p3 = scmp.lt.s32.totalorder %s854_s28, %s854_s28 }
  0x29   :  { %v109_v11 = vld [vmem:[#allocation5 + $0x1b0] sm:$0xff]  ;;  %208 = vmatpush1.msra.mxu0 %v111_v6  ;;  %279 = vmatpush1.msra.mxu1 %v113_v7  ;;  %v104_v12 = vld [vmem:[#allocation5 + $0x188] sm:$0xff]  ;;  %v106_v13 = vld [vmem:[#allocation5 + $0x198] sm:$0xff] }
  0x2a   :  { %209 = vmatprep.subr.mxu0 %v108_v8  ;;  %280 = vmatprep.subr.mxu1 %v110_v9  ;;  %v103_v14 = vld [vmem:[#allocation5 + $0x180] sm:$0xff]  ;;  %v105_v15 = vld [vmem:[#allocation5 + $0x190] sm:$0xff]  ;;  %v100_v16 = vld [vmem:[#allocation5 + $0x168] sm:$0xff]  ;;  %p861_p4 = por %p860_p3, %p859_p2 }
  0x2b   :  { %210 = vmatpush1.msra.mxu0 %v107_v10  ;;  %281 = vmatpush1.msra.mxu1 %v109_v11  ;;  %v102_v17 = vld [vmem:[#allocation5 + $0x178] sm:$0xff]  ;;  %v99_v18 = vld [vmem:[#allocation5 + $0x160] sm:$0xff]  ;;  %v101_v19 = vld [vmem:[#allocation5 + $0x170] sm:$0xff] }
  0x2c   :  { %211 = vmatprep.subr.mxu0 %v104_v12  ;;  %282 = vmatprep.subr.mxu1 %v106_v13  ;;  %v96_v20 = vld [vmem:[#allocation5 + $0x148] sm:$0xff]  ;;  %v98_v21 = vld [vmem:[#allocation5 + $0x158] sm:$0xff]  ;;  %v95_v22 = vld [vmem:[#allocation5 + $0x140] sm:$0xff]  ;;  %p862_p5 = pnand %p861_p4, %p855_p1 }
  0x2d   :  { %212 = vmatpush1.msra.mxu0 %v103_v14  ;;  %283 = vmatpush1.msra.mxu1 %v105_v15  ;;  %v97_v23 = vld [vmem:[#allocation5 + $0x150] sm:$0xff]  ;;  %v92_v24 = vld [vmem:[#allocation5 + $0x128] sm:$0xff]  ;;  %v94_v25 = vld [vmem:[#allocation5 + $0x138] sm:$0xff] }
  0x2e   :  { %213 = vmatprep.subr.mxu0 %v100_v16  ;;  %284 = vmatprep.subr.mxu1 %v102_v17  ;;  %v91_v26 = vld [vmem:[#allocation5 + $0x120] sm:$0xff]  ;;  %v93_v27 = vld [vmem:[#allocation5 + $0x130] sm:$0xff]  ;;  %v88_v28 = vld [vmem:[#allocation5 + $0x108] sm:$0xff] }
  0x2f   :  { %214 = vmatpush1.msra.mxu0 %v99_v18  ;;  %285 = vmatpush1.msra.mxu1 %v101_v19  ;;  %v90_v29 = vld [vmem:[#allocation5 + $0x118] sm:$0xff]  ;;  %v87_v30 = vld [vmem:[#allocation5 + $0x100] sm:$0xff]  ;;  %v89_v31 = vld [vmem:[#allocation5 + $0x110] sm:$0xff] }
  0x30   :  { %215 = vmatprep.subr.mxu0 %v96_v20  ;;  %286 = vmatprep.subr.mxu1 %v98_v21  ;;  %v84_v32 = vld [vmem:[#allocation5 + $0xe8] sm:$0xff]  ;;  %v86_v33 = vld [vmem:[#allocation5 + $0xf8] sm:$0xff]  ;;  %v83_v34 = vld [vmem:[#allocation5 + $0xe0] sm:$0xff] }
  0x31   :  { %216 = vmatpush1.msra.mxu0 %v95_v22  ;;  %287 = vmatpush1.msra.mxu1 %v97_v23  ;;  %v85_v35 = vld [vmem:[#allocation5 + $0xf0] sm:$0xff]  ;;  %v80_v36 = vld [vmem:[#allocation5 + $0xc8] sm:$0xff]  ;;  %v82_v37 = vld [vmem:[#allocation5 + $0xd8] sm:$0xff] }
  0x32   :  { %217 = vmatprep.subr.mxu0 %v92_v24  ;;  %288 = vmatprep.subr.mxu1 %v94_v25  ;;  %v79_v38 = vld [vmem:[#allocation5 + $0xc0] sm:$0xff]  ;;  %v81_v39 = vld [vmem:[#allocation5 + $0xd0] sm:$0xff]  ;;  %v76_v40 = vld [vmem:[#allocation5 + $0xa8] sm:$0xff] }
  0x33   :  { %218 = vmatpush1.msra.mxu0 %v91_v26  ;;  %289 = vmatpush1.msra.mxu1 %v93_v27  ;;  %v78_v41 = vld [vmem:[#allocation5 + $0xb8] sm:$0xff]  ;;  %v75_v42 = vld [vmem:[#allocation5 + $0xa0] sm:$0xff]  ;;  %v77_v43 = vld [vmem:[#allocation5 + $0xb0] sm:$0xff] }
  0x34   :  { %219 = vmatprep.subr.mxu0 %v88_v28  ;;  %290 = vmatprep.subr.mxu1 %v90_v29  ;;  %v72_v44 = vld [vmem:[#allocation5 + $0x88] sm:$0xff]  ;;  %v74_v45 = vld [vmem:[#allocation5 + $0x98] sm:$0xff]  ;;  %v71_v46 = vld [vmem:[#allocation5 + $0x80] sm:$0xff] }
  0x35   :  { %220 = vmatpush1.msra.mxu0 %v87_v30  ;;  %291 = vmatpush1.msra.mxu1 %v89_v31  ;;  %v73_v47 = vld [vmem:[#allocation5 + $0x90] sm:$0xff]  ;;  %v68_v48 = vld [vmem:[#allocation5 + $0x68] sm:$0xff]  ;;  %v70_v49 = vld [vmem:[#allocation5 + $0x78] sm:$0xff] }
  0x36   :  { %221 = vmatprep.subr.mxu0 %v84_v32  ;;  %292 = vmatprep.subr.mxu1 %v86_v33  ;;  %v67_v50 = vld [vmem:[#allocation5 + $0x60] sm:$0xff]  ;;  %v69_v51 = vld [vmem:[#allocation5 + $0x70] sm:$0xff]  ;;  %v64_v52 = vld [vmem:[#allocation5 + $0x48] sm:$0xff] }
  0x37   :  { %222 = vmatpush1.msra.mxu0 %v83_v34  ;;  %293 = vmatpush1.msra.mxu1 %v85_v35  ;;  %v66_v53 = vld [vmem:[#allocation5 + $0x58] sm:$0xff]  ;;  %v63_v54 = vld [vmem:[#allocation5 + $0x40] sm:$0xff]  ;;  %v65_v55 = vld [vmem:[#allocation5 + $0x50] sm:$0xff] }
  0x38   :  { %223 = vmatprep.subr.mxu0 %v80_v36  ;;  %294 = vmatprep.subr.mxu1 %v82_v37  ;;  %v60_v56 = vld [vmem:[#allocation5 + $0x28] sm:$0xff]  ;;  %v62_v57 = vld [vmem:[#allocation5 + $0x38] sm:$0xff]  ;;  %v59_v58 = vld [vmem:[#allocation5 + $0x20] sm:$0xff] }
  0x39   :  { %224 = vmatpush1.msra.mxu0 %v79_v38  ;;  %295 = vmatpush1.msra.mxu1 %v81_v39  ;;  %v61_v59 = vld [vmem:[#allocation5 + $0x30] sm:$0xff]  ;;  %v56_v60 = vld [vmem:[#allocation5 + $0x8] sm:$0xff]  ;;  %v58_v61 = vld [vmem:[#allocation5 + $0x18] sm:$0xff] }
  0x3a   :  { %225 = vmatprep.subr.mxu0 %v76_v40  ;;  %296 = vmatprep.subr.mxu1 %v78_v41  ;;  %v55_v62 = vld [vmem:[#allocation5] sm:$0xff]  ;;  %v57_v63 = vld [vmem:[#allocation5 + $0x10] sm:$0xff]  ;;  %v180_v0 = vld [vmem:[#allocation5 + $0x3e8] sm:$0xff] }
  0x3b   :  { %226 = vmatpush1.msra.mxu0 %v75_v42  ;;  %297 = vmatpush1.msra.mxu1 %v77_v43  ;;  %v182_v1 = vld [vmem:[#allocation5 + $0x3f8] sm:$0xff]  ;;  %v179_v2 = vld [vmem:[#allocation5 + $0x3e0] sm:$0xff]  ;;  %v181_v3 = vld [vmem:[#allocation5 + $0x3f0] sm:$0xff] }
  0x3c   :  { %227 = vmatprep.subr.mxu0 %v72_v44  ;;  %298 = vmatprep.subr.mxu1 %v74_v45  ;;  %v176_v4 = vld [vmem:[#allocation5 + $0x3c8] sm:$0xff]  ;;  %v178_v5 = vld [vmem:[#allocation5 + $0x3d8] sm:$0xff]  ;;  %v175_v6 = vld [vmem:[#allocation5 + $0x3c0] sm:$0xff] }
  0x3d   :  { %228 = vmatpush1.msra.mxu0 %v71_v46  ;;  %299 = vmatpush1.msra.mxu1 %v73_v47  ;;  %v177_v7 = vld [vmem:[#allocation5 + $0x3d0] sm:$0xff]  ;;  %v172_v8 = vld [vmem:[#allocation5 + $0x3a8] sm:$0xff]  ;;  %v174_v9 = vld [vmem:[#allocation5 + $0x3b8] sm:$0xff] }
  0x3e   :  { %229 = vmatprep.subr.mxu0 %v68_v48  ;;  %300 = vmatprep.subr.mxu1 %v70_v49  ;;  %v171_v10 = vld [vmem:[#allocation5 + $0x3a0] sm:$0xff]  ;;  %v173_v11 = vld [vmem:[#allocation5 + $0x3b0] sm:$0xff]  ;;  %v168_v12 = vld [vmem:[#allocation5 + $0x388] sm:$0xff] }
  0x3f   :  { %230 = vmatpush1.msra.mxu0 %v67_v50  ;;  %301 = vmatpush1.msra.mxu1 %v69_v51  ;;  %v170_v13 = vld [vmem:[#allocation5 + $0x398] sm:$0xff]  ;;  %v167_v14 = vld [vmem:[#allocation5 + $0x380] sm:$0xff]  ;;  %v169_v15 = vld [vmem:[#allocation5 + $0x390] sm:$0xff] }
  0x40   :  { %231 = vmatprep.subr.mxu0 %v64_v52  ;;  %302 = vmatprep.subr.mxu1 %v66_v53  ;;  %v164_v16 = vld [vmem:[#allocation5 + $0x368] sm:$0xff]  ;;  %v166_v17 = vld [vmem:[#allocation5 + $0x378] sm:$0xff]  ;;  %v163_v18 = vld [vmem:[#allocation5 + $0x360] sm:$0xff] }
  0x41   :  { %232 = vmatpush1.msra.mxu0 %v63_v54  ;;  %303 = vmatpush1.msra.mxu1 %v65_v55  ;;  %v165_v19 = vld [vmem:[#allocation5 + $0x370] sm:$0xff]  ;;  %v160_v20 = vld [vmem:[#allocation5 + $0x348] sm:$0xff]  ;;  %v162_v21 = vld [vmem:[#allocation5 + $0x358] sm:$0xff] }
  0x42   :  { %233 = vmatprep.subr.mxu0 %v60_v56  ;;  %304 = vmatprep.subr.mxu1 %v62_v57  ;;  %v159_v22 = vld [vmem:[#allocation5 + $0x340] sm:$0xff]  ;;  %v161_v23 = vld [vmem:[#allocation5 + $0x350] sm:$0xff]  ;;  %v156_v24 = vld [vmem:[#allocation5 + $0x328] sm:$0xff] }
  0x43   :  { %234 = vmatpush1.msra.mxu0 %v59_v58  ;;  %305 = vmatpush1.msra.mxu1 %v61_v59  ;;  %v158_v25 = vld [vmem:[#allocation5 + $0x338] sm:$0xff]  ;;  %v155_v26 = vld [vmem:[#allocation5 + $0x320] sm:$0xff]  ;;  %v157_v27 = vld [vmem:[#allocation5 + $0x330] sm:$0xff] }
  0x44   :  { %235 = vmatprep.subr.mxu0 %v56_v60  ;;  %306 = vmatprep.subr.mxu1 %v58_v61  ;;  %v152_v28 = vld [vmem:[#allocation5 + $0x308] sm:$0xff]  ;;  %v154_v29 = vld [vmem:[#allocation5 + $0x318] sm:$0xff]  ;;  %v151_v30 = vld [vmem:[#allocation5 + $0x300] sm:$0xff] }
  0x45   :  { %236 = vmatpush1.msra.mxu0 %v55_v62  ;;  %307 = vmatpush1.msra.mxu1 %v57_v63  ;;  %v153_v31 = vld [vmem:[#allocation5 + $0x310] sm:$0xff]  ;;  %v148_v32 = vld [vmem:[#allocation5 + $0x2e8] sm:$0xff]  ;;  %v150_v33 = vld [vmem:[#allocation5 + $0x2f8] sm:$0xff] }
  0x46   :  { %237 = vmatprep.subr.mxu0 %v180_v0  ;;  %308 = vmatprep.subr.mxu1 %v182_v1  ;;  %v147_v34 = vld [vmem:[#allocation5 + $0x2e0] sm:$0xff]  ;;  %v149_v35 = vld [vmem:[#allocation5 + $0x2f0] sm:$0xff]  ;;  %v144_v36 = vld [vmem:[#allocation5 + $0x2c8] sm:$0xff] }
  0x47   :  { %238 = vmatpush2.msra.mxu0 %v179_v2  ;;  %309 = vmatpush2.msra.mxu1 %v181_v3  ;;  %v146_v37 = vld [vmem:[#allocation5 + $0x2d8] sm:$0xff]  ;;  %v143_v38 = vld [vmem:[#allocation5 + $0x2c0] sm:$0xff]  ;;  %v145_v39 = vld [vmem:[#allocation5 + $0x2d0] sm:$0xff] }
  0x48   :  { %239 = vmatprep.subr.mxu0 %v176_v4  ;;  %310 = vmatprep.subr.mxu1 %v178_v5  ;;  %v140_v40 = vld [vmem:[#allocation5 + $0x2a8] sm:$0xff]  ;;  %v142_v41 = vld [vmem:[#allocation5 + $0x2b8] sm:$0xff]  ;;  %v139_v42 = vld [vmem:[#allocation5 + $0x2a0] sm:$0xff] }
  0x49   :  { %240 = vmatpush2.msra.mxu0 %v175_v6  ;;  %311 = vmatpush2.msra.mxu1 %v177_v7  ;;  %v141_v43 = vld [vmem:[#allocation5 + $0x2b0] sm:$0xff]  ;;  %v136_v44 = vld [vmem:[#allocation5 + $0x288] sm:$0xff]  ;;  %v138_v45 = vld [vmem:[#allocation5 + $0x298] sm:$0xff] }
  0x4a   :  { %241 = vmatprep.subr.mxu0 %v172_v8  ;;  %312 = vmatprep.subr.mxu1 %v174_v9  ;;  %v135_v46 = vld [vmem:[#allocation5 + $0x280] sm:$0xff]  ;;  %v137_v47 = vld [vmem:[#allocation5 + $0x290] sm:$0xff]  ;;  %v132_v48 = vld [vmem:[#allocation5 + $0x268] sm:$0xff] }
  0x4b   :  { %242 = vmatpush2.msra.mxu0 %v171_v10  ;;  %313 = vmatpush2.msra.mxu1 %v173_v11  ;;  %v134_v49 = vld [vmem:[#allocation5 + $0x278] sm:$0xff]  ;;  %v131_v50 = vld [vmem:[#allocation5 + $0x260] sm:$0xff]  ;;  %v133_v51 = vld [vmem:[#allocation5 + $0x270] sm:$0xff] }
  0x4c   :  { %243 = vmatprep.subr.mxu0 %v168_v12  ;;  %314 = vmatprep.subr.mxu1 %v170_v13  ;;  %v128_v52 = vld [vmem:[#allocation5 + $0x248] sm:$0xff]  ;;  %v130_v53 = vld [vmem:[#allocation5 + $0x258] sm:$0xff]  ;;  %v127_v54 = vld [vmem:[#allocation5 + $0x240] sm:$0xff] }
  0x4d   :  { %244 = vmatpush2.msra.mxu0 %v167_v14  ;;  %315 = vmatpush2.msra.mxu1 %v169_v15  ;;  %v129_v55 = vld [vmem:[#allocation5 + $0x250] sm:$0xff]  ;;  %v124_v56 = vld [vmem:[#allocation5 + $0x228] sm:$0xff]  ;;  %v126_v57 = vld [vmem:[#allocation5 + $0x238] sm:$0xff] }
  0x4e   :  { %245 = vmatprep.subr.mxu0 %v164_v16  ;;  %316 = vmatprep.subr.mxu1 %v166_v17  ;;  %v123_v58 = vld [vmem:[#allocation5 + $0x220] sm:$0xff]  ;;  %v125_v59 = vld [vmem:[#allocation5 + $0x230] sm:$0xff]  ;;  %v120_v60 = vld [vmem:[#allocation5 + $0x208] sm:$0xff] }
  0x4f   :  { %246 = vmatpush2.msra.mxu0 %v163_v18  ;;  %317 = vmatpush2.msra.mxu1 %v165_v19  ;;  %v122_v61 = vld [vmem:[#allocation5 + $0x218] sm:$0xff]  ;;  %v119_v62 = vld [vmem:[#allocation5 + $0x200] sm:$0xff]  ;;  %v121_v0 = vld [vmem:[#allocation5 + $0x210] sm:$0xff] }
  0x50   :  { %247 = vmatprep.subr.mxu0 %v160_v20  ;;  %318 = vmatprep.subr.mxu1 %v162_v21  ;;  %v53_v63 = vld [vmem:[#allocation2 + $0x8] sm:$0xff]  ;;  %v52_v1 = vld [vmem:[#allocation2] sm:$0xff]  ;;  %v442_v2 = vld [vmem:[#allocation5 + $0x5e8] sm:$0xff] }
  0x51   :  { %248 = vmatpush2.msra.mxu0 %v159_v22  ;;  %319 = vmatpush2.msra.mxu1 %v161_v23  ;;  %v444_v3 = vld [vmem:[#allocation5 + $0x5f8] sm:$0xff]  ;;  %v441_v4 = vld [vmem:[#allocation5 + $0x5e0] sm:$0xff]  ;;  %v443_v5 = vld [vmem:[#allocation5 + $0x5f0] sm:$0xff] }
  0x52   :  { %249 = vmatprep.subr.mxu0 %v156_v24  ;;  %320 = vmatprep.subr.mxu1 %v158_v25  ;;  %v438_v6 = vld [vmem:[#allocation5 + $0x5c8] sm:$0xff]  ;;  %v440_v7 = vld [vmem:[#allocation5 + $0x5d8] sm:$0xff]  ;;  %v437_v8 = vld [vmem:[#allocation5 + $0x5c0] sm:$0xff] }
  0x53   :  { %250 = vmatpush2.msra.mxu0 %v155_v26  ;;  %321 = vmatpush2.msra.mxu1 %v157_v27  ;;  %v439_v9 = vld [vmem:[#allocation5 + $0x5d0] sm:$0xff]  ;;  %v434_v10 = vld [vmem:[#allocation5 + $0x5a8] sm:$0xff]  ;;  %v436_v11 = vld [vmem:[#allocation5 + $0x5b8] sm:$0xff] }
  0x54   :  { %251 = vmatprep.subr.mxu0 %v152_v28  ;;  %322 = vmatprep.subr.mxu1 %v154_v29  ;;  %v433_v12 = vld [vmem:[#allocation5 + $0x5a0] sm:$0xff]  ;;  %v435_v13 = vld [vmem:[#allocation5 + $0x5b0] sm:$0xff]  ;;  %v430_v14 = vld [vmem:[#allocation5 + $0x588] sm:$0xff] }
  0x55   :  { %252 = vmatpush2.msra.mxu0 %v151_v30  ;;  %323 = vmatpush2.msra.mxu1 %v153_v31  ;;  %v432_v15 = vld [vmem:[#allocation5 + $0x598] sm:$0xff]  ;;  %v429_v16 = vld [vmem:[#allocation5 + $0x580] sm:$0xff]  ;;  %v431_v17 = vld [vmem:[#allocation5 + $0x590] sm:$0xff] }
  0x56   :  { %253 = vmatprep.subr.mxu0 %v148_v32  ;;  %324 = vmatprep.subr.mxu1 %v150_v33  ;;  %v426_v18 = vld [vmem:[#allocation5 + $0x568] sm:$0xff]  ;;  %v428_v19 = vld [vmem:[#allocation5 + $0x578] sm:$0xff]  ;;  %v425_v20 = vld [vmem:[#allocation5 + $0x560] sm:$0xff] }
  0x57   :  { %254 = vmatpush2.msra.mxu0 %v147_v34  ;;  %325 = vmatpush2.msra.mxu1 %v149_v35  ;;  %v427_v21 = vld [vmem:[#allocation5 + $0x570] sm:$0xff]  ;;  %v422_v22 = vld [vmem:[#allocation5 + $0x548] sm:$0xff]  ;;  %v424_v23 = vld [vmem:[#allocation5 + $0x558] sm:$0xff] }
  0x58   :  { %255 = vmatprep.subr.mxu0 %v144_v36  ;;  %326 = vmatprep.subr.mxu1 %v146_v37  ;;  %v421_v24 = vld [vmem:[#allocation5 + $0x540] sm:$0xff]  ;;  %v423_v25 = vld [vmem:[#allocation5 + $0x550] sm:$0xff]  ;;  %v418_v26 = vld [vmem:[#allocation5 + $0x528] sm:$0xff] }
  0x59   :  { %256 = vmatpush2.msra.mxu0 %v143_v38  ;;  %327 = vmatpush2.msra.mxu1 %v145_v39  ;;  %v420_v27 = vld [vmem:[#allocation5 + $0x538] sm:$0xff]  ;;  %v417_v28 = vld [vmem:[#allocation5 + $0x520] sm:$0xff]  ;;  %v419_v29 = vld [vmem:[#allocation5 + $0x530] sm:$0xff] }
  0x5a   :  { %257 = vmatprep.subr.mxu0 %v140_v40  ;;  %328 = vmatprep.subr.mxu1 %v142_v41  ;;  %v414_v30 = vld [vmem:[#allocation5 + $0x508] sm:$0xff]  ;;  %v416_v31 = vld [vmem:[#allocation5 + $0x518] sm:$0xff]  ;;  %v413_v32 = vld [vmem:[#allocation5 + $0x500] sm:$0xff] }
  0x5b   :  { %258 = vmatpush2.msra.mxu0 %v139_v42  ;;  %329 = vmatpush2.msra.mxu1 %v141_v43  ;;  %v415_v33 = vld [vmem:[#allocation5 + $0x510] sm:$0xff]  ;;  %v410_v34 = vld [vmem:[#allocation5 + $0x4e8] sm:$0xff]  ;;  %v412_v35 = vld [vmem:[#allocation5 + $0x4f8] sm:$0xff] }
  0x5c   :  { %259 = vmatprep.subr.mxu0 %v136_v44  ;;  %330 = vmatprep.subr.mxu1 %v138_v45  ;;  %v409_v36 = vld [vmem:[#allocation5 + $0x4e0] sm:$0xff]  ;;  %v411_v37 = vld [vmem:[#allocation5 + $0x4f0] sm:$0xff]  ;;  %v406_v38 = vld [vmem:[#allocation5 + $0x4c8] sm:$0xff] }
  0x5d   :  { %260 = vmatpush2.msra.mxu0 %v135_v46  ;;  %331 = vmatpush2.msra.mxu1 %v137_v47  ;;  %v408_v39 = vld [vmem:[#allocation5 + $0x4d8] sm:$0xff]  ;;  %v405_v40 = vld [vmem:[#allocation5 + $0x4c0] sm:$0xff]  ;;  %v407_v41 = vld [vmem:[#allocation5 + $0x4d0] sm:$0xff] }
  0x5e   :  { %261 = vmatprep.subr.mxu0 %v132_v48  ;;  %332 = vmatprep.subr.mxu1 %v134_v49  ;;  %v402_v42 = vld [vmem:[#allocation5 + $0x4a8] sm:$0xff]  ;;  %v404_v43 = vld [vmem:[#allocation5 + $0x4b8] sm:$0xff]  ;;  %v401_v44 = vld [vmem:[#allocation5 + $0x4a0] sm:$0xff] }
  0x5f   :  { %262 = vmatpush2.msra.mxu0 %v131_v50  ;;  %333 = vmatpush2.msra.mxu1 %v133_v51  ;;  %v403_v45 = vld [vmem:[#allocation5 + $0x4b0] sm:$0xff]  ;;  %v398_v46 = vld [vmem:[#allocation5 + $0x488] sm:$0xff]  ;;  %v400_v47 = vld [vmem:[#allocation5 + $0x498] sm:$0xff] }
  0x60   :  { %263 = vmatprep.subr.mxu0 %v128_v52  ;;  %334 = vmatprep.subr.mxu1 %v130_v53  ;;  %v397_v48 = vld [vmem:[#allocation5 + $0x480] sm:$0xff]  ;;  %v399_v49 = vld [vmem:[#allocation5 + $0x490] sm:$0xff]  ;;  %v394_v50 = vld [vmem:[#allocation5 + $0x468] sm:$0xff] }
  0x61   :  { %264 = vmatpush2.msra.mxu0 %v127_v54  ;;  %335 = vmatpush2.msra.mxu1 %v129_v55  ;;  %v396_v51 = vld [vmem:[#allocation5 + $0x478] sm:$0xff]  ;;  %v393_v52 = vld [vmem:[#allocation5 + $0x460] sm:$0xff]  ;;  %v395_v53 = vld [vmem:[#allocation5 + $0x470] sm:$0xff] }
  0x62   :  { %265 = vmatprep.subr.mxu0 %v124_v56  ;;  %336 = vmatprep.subr.mxu1 %v126_v57  ;;  %v390_v54 = vld [vmem:[#allocation5 + $0x448] sm:$0xff]  ;;  %v392_v55 = vld [vmem:[#allocation5 + $0x458] sm:$0xff]  ;;  %v389_v56 = vld [vmem:[#allocation5 + $0x440] sm:$0xff] }
  0x63   :  { %266 = vmatpush2.msra.mxu0 %v123_v58  ;;  %337 = vmatpush2.msra.mxu1 %v125_v59  ;;  %v391_v57 = vld [vmem:[#allocation5 + $0x450] sm:$0xff]  ;;  %v386_v58 = vld [vmem:[#allocation5 + $0x428] sm:$0xff]  ;;  %v388_v59 = vld [vmem:[#allocation5 + $0x438] sm:$0xff] }
  0x64   :  { %267 = vmatprep.subr.mxu0 %v120_v60  ;;  %338 = vmatprep.subr.mxu1 %v122_v61  ;;  %v385_v60 = vld [vmem:[#allocation5 + $0x420] sm:$0xff]  ;;  %v387_v61 = vld [vmem:[#allocation5 + $0x430] sm:$0xff] }
  0x65   :  { %268 = vmatpush2.msra.mxu0 %v119_v62  ;;  %269 = vmatprep.mubr.f32.mxu0 %v53_v63  ;;  %v382_v62 = vld [vmem:[#allocation5 + $0x408] sm:$0xff] }
  0x66   :  { %339 = vmatpush2.msra.mxu1 %v121_v0  ;;  %340 = vmatprep.mubr.f32.mxu1 %v53_v63  ;;  %v384_v63 = vld [vmem:[#allocation5 + $0x418] sm:$0xff]  ;;  %v381_v0 = vld [vmem:[#allocation5 + $0x400] sm:$0xff] }
  0x67   :  { %270 = vmatmul.mubr.f32.vlgmr.msra.gmra.mxu0 %v52_v1  ;;  %341 = vmatmul.mubr.f32.vlgmr.msra.gmra.mxu1 %v52_v1  ;;  %v383_v1 = vld [vmem:[#allocation5 + $0x410] sm:$0xff] }
  0x68   :  { %532 = vmatprep.subr.mxu0 %v442_v2  ;;  %603 = vmatprep.subr.mxu1 %v444_v3  ;;  %v506_v2 = vld [vmem:[#allocation5 + $0x7e8] sm:$0xff]  ;;  %v508_v3 = vld [vmem:[#allocation5 + $0x7f8] sm:$0xff] }
  0x69   :  { %533 = vmatpush1.msra.mxu0 %v441_v4  ;;  %604 = vmatpush1.msra.mxu1 %v443_v5  ;;  %v505_v4 = vld [vmem:[#allocation5 + $0x7e0] sm:$0xff]  ;;  %v507_v5 = vld [vmem:[#allocation5 + $0x7f0] sm:$0xff] }
  0x6a   :  { %534 = vmatprep.subr.mxu0 %v438_v6  ;;  %605 = vmatprep.subr.mxu1 %v440_v7  ;;  %v502_v6 = vld [vmem:[#allocation5 + $0x7c8] sm:$0xff]  ;;  %v504_v7 = vld [vmem:[#allocation5 + $0x7d8] sm:$0xff] }
  0x6b   :  { %535 = vmatpush1.msra.mxu0 %v437_v8  ;;  %606 = vmatpush1.msra.mxu1 %v439_v9  ;;  %v501_v8 = vld [vmem:[#allocation5 + $0x7c0] sm:$0xff]  ;;  %v503_v9 = vld [vmem:[#allocation5 + $0x7d0] sm:$0xff] }
  0x6c   :  { %536 = vmatprep.subr.mxu0 %v434_v10  ;;  %607 = vmatprep.subr.mxu1 %v436_v11  ;;  %v498_v10 = vld [vmem:[#allocation5 + $0x7a8] sm:$0xff]  ;;  %v500_v11 = vld [vmem:[#allocation5 + $0x7b8] sm:$0xff] }
  0x6d   :  { %537 = vmatpush1.msra.mxu0 %v433_v12  ;;  %608 = vmatpush1.msra.mxu1 %v435_v13  ;;  %v497_v12 = vld [vmem:[#allocation5 + $0x7a0] sm:$0xff]  ;;  %v499_v13 = vld [vmem:[#allocation5 + $0x7b0] sm:$0xff] }
  0x6e   :  { %538 = vmatprep.subr.mxu0 %v430_v14  ;;  %609 = vmatprep.subr.mxu1 %v432_v15  ;;  %v494_v14 = vld [vmem:[#allocation5 + $0x788] sm:$0xff]  ;;  %v496_v15 = vld [vmem:[#allocation5 + $0x798] sm:$0xff] }
  0x6f   :  { %539 = vmatpush1.msra.mxu0 %v429_v16  ;;  %610 = vmatpush1.msra.mxu1 %v431_v17  ;;  %v493_v16 = vld [vmem:[#allocation5 + $0x780] sm:$0xff]  ;;  %v495_v17 = vld [vmem:[#allocation5 + $0x790] sm:$0xff] }
  0x70   :  { %540 = vmatprep.subr.mxu0 %v426_v18  ;;  %611 = vmatprep.subr.mxu1 %v428_v19  ;;  %v490_v18 = vld [vmem:[#allocation5 + $0x768] sm:$0xff]  ;;  %v492_v19 = vld [vmem:[#allocation5 + $0x778] sm:$0xff] }
  0x71   :  { %541 = vmatpush1.msra.mxu0 %v425_v20  ;;  %612 = vmatpush1.msra.mxu1 %v427_v21  ;;  %v489_v20 = vld [vmem:[#allocation5 + $0x760] sm:$0xff]  ;;  %v491_v21 = vld [vmem:[#allocation5 + $0x770] sm:$0xff] }
  0x72   :  { %542 = vmatprep.subr.mxu0 %v422_v22  ;;  %613 = vmatprep.subr.mxu1 %v424_v23  ;;  %v486_v22 = vld [vmem:[#allocation5 + $0x748] sm:$0xff]  ;;  %v488_v23 = vld [vmem:[#allocation5 + $0x758] sm:$0xff] }
  0x73   :  { %543 = vmatpush1.msra.mxu0 %v421_v24  ;;  %614 = vmatpush1.msra.mxu1 %v423_v25  ;;  %v485_v24 = vld [vmem:[#allocation5 + $0x740] sm:$0xff]  ;;  %v487_v25 = vld [vmem:[#allocation5 + $0x750] sm:$0xff] }
  0x74   :  { %544 = vmatprep.subr.mxu0 %v418_v26  ;;  %615 = vmatprep.subr.mxu1 %v420_v27  ;;  %v482_v26 = vld [vmem:[#allocation5 + $0x728] sm:$0xff]  ;;  %v484_v27 = vld [vmem:[#allocation5 + $0x738] sm:$0xff] }
  0x75   :  { %545 = vmatpush1.msra.mxu0 %v417_v28  ;;  %616 = vmatpush1.msra.mxu1 %v419_v29  ;;  %v481_v28 = vld [vmem:[#allocation5 + $0x720] sm:$0xff]  ;;  %v483_v29 = vld [vmem:[#allocation5 + $0x730] sm:$0xff] }
  0x76   :  { %546 = vmatprep.subr.mxu0 %v414_v30  ;;  %617 = vmatprep.subr.mxu1 %v416_v31  ;;  %v478_v30 = vld [vmem:[#allocation5 + $0x708] sm:$0xff]  ;;  %v480_v31 = vld [vmem:[#allocation5 + $0x718] sm:$0xff] }
  0x77   :  { %547 = vmatpush1.msra.mxu0 %v413_v32  ;;  %618 = vmatpush1.msra.mxu1 %v415_v33  ;;  %v477_v32 = vld [vmem:[#allocation5 + $0x700] sm:$0xff]  ;;  %v479_v33 = vld [vmem:[#allocation5 + $0x710] sm:$0xff] }
  0x78   :  { %548 = vmatprep.subr.mxu0 %v410_v34  ;;  %619 = vmatprep.subr.mxu1 %v412_v35  ;;  %v474_v34 = vld [vmem:[#allocation5 + $0x6e8] sm:$0xff]  ;;  %v476_v35 = vld [vmem:[#allocation5 + $0x6f8] sm:$0xff] }
  0x79   :  { %549 = vmatpush1.msra.mxu0 %v409_v36  ;;  %620 = vmatpush1.msra.mxu1 %v411_v37  ;;  %v473_v36 = vld [vmem:[#allocation5 + $0x6e0] sm:$0xff]  ;;  %v475_v37 = vld [vmem:[#allocation5 + $0x6f0] sm:$0xff] }
  0x7a   :  { %550 = vmatprep.subr.mxu0 %v406_v38  ;;  %621 = vmatprep.subr.mxu1 %v408_v39  ;;  %v470_v38 = vld [vmem:[#allocation5 + $0x6c8] sm:$0xff]  ;;  %v472_v39 = vld [vmem:[#allocation5 + $0x6d8] sm:$0xff] }
  0x7b   :  { %551 = vmatpush1.msra.mxu0 %v405_v40  ;;  %622 = vmatpush1.msra.mxu1 %v407_v41  ;;  %v469_v40 = vld [vmem:[#allocation5 + $0x6c0] sm:$0xff]  ;;  %v471_v41 = vld [vmem:[#allocation5 + $0x6d0] sm:$0xff] }
  0x7c   :  { %552 = vmatprep.subr.mxu0 %v402_v42  ;;  %623 = vmatprep.subr.mxu1 %v404_v43  ;;  %v466_v42 = vld [vmem:[#allocation5 + $0x6a8] sm:$0xff]  ;;  %v468_v43 = vld [vmem:[#allocation5 + $0x6b8] sm:$0xff] }
  0x7d   :  { %553 = vmatpush1.msra.mxu0 %v401_v44  ;;  %624 = vmatpush1.msra.mxu1 %v403_v45  ;;  %v465_v44 = vld [vmem:[#allocation5 + $0x6a0] sm:$0xff]  ;;  %v467_v45 = vld [vmem:[#allocation5 + $0x6b0] sm:$0xff] }
  0x7e   :  { %554 = vmatprep.subr.mxu0 %v398_v46  ;;  %625 = vmatprep.subr.mxu1 %v400_v47  ;;  %v462_v46 = vld [vmem:[#allocation5 + $0x688] sm:$0xff]  ;;  %v464_v47 = vld [vmem:[#allocation5 + $0x698] sm:$0xff] }
  0x7f   :  { %555 = vmatpush1.msra.mxu0 %v397_v48  ;;  %626 = vmatpush1.msra.mxu1 %v399_v49  ;;  %v461_v48 = vld [vmem:[#allocation5 + $0x680] sm:$0xff]  ;;  %v463_v49 = vld [vmem:[#allocation5 + $0x690] sm:$0xff] }
  0x80   :  { %556 = vmatprep.subr.mxu0 %v394_v50  ;;  %627 = vmatprep.subr.mxu1 %v396_v51  ;;  %v458_v50 = vld [vmem:[#allocation5 + $0x668] sm:$0xff]  ;;  %v460_v51 = vld [vmem:[#allocation5 + $0x678] sm:$0xff] }
  0x81   :  { %557 = vmatpush1.msra.mxu0 %v393_v52  ;;  %628 = vmatpush1.msra.mxu1 %v395_v53  ;;  %v457_v52 = vld [vmem:[#allocation5 + $0x660] sm:$0xff]  ;;  %v459_v53 = vld [vmem:[#allocation5 + $0x670] sm:$0xff] }
  0x82   :  { %558 = vmatprep.subr.mxu0 %v390_v54  ;;  %629 = vmatprep.subr.mxu1 %v392_v55  ;;  %v454_v54 = vld [vmem:[#allocation5 + $0x648] sm:$0xff]  ;;  %v456_v55 = vld [vmem:[#allocation5 + $0x658] sm:$0xff] }
  0x83   :  { %559 = vmatpush1.msra.mxu0 %v389_v56  ;;  %630 = vmatpush1.msra.mxu1 %v391_v57  ;;  %v453_v56 = vld [vmem:[#allocation5 + $0x640] sm:$0xff]  ;;  %v455_v57 = vld [vmem:[#allocation5 + $0x650] sm:$0xff] }
  0x84   :  { %560 = vmatprep.subr.mxu0 %v386_v58  ;;  %631 = vmatprep.subr.mxu1 %v388_v59  ;;  %v450_v58 = vld [vmem:[#allocation5 + $0x628] sm:$0xff]  ;;  %v452_v59 = vld [vmem:[#allocation5 + $0x638] sm:$0xff] }
  0x85   :  { %561 = vmatpush1.msra.mxu0 %v385_v60  ;;  %632 = vmatpush1.msra.mxu1 %v387_v61  ;;  %v449_v60 = vld [vmem:[#allocation5 + $0x620] sm:$0xff]  ;;  %v451_v61 = vld [vmem:[#allocation5 + $0x630] sm:$0xff] }
  0x86   :  { %562 = vmatprep.subr.mxu0 %v382_v62  ;;  %633 = vmatprep.subr.mxu1 %v384_v63  ;;  %v446_v62 = vld [vmem:[#allocation5 + $0x608] sm:$0xff]  ;;  %v448_v63 = vld [vmem:[#allocation5 + $0x618] sm:$0xff] }
  0x87   :  { %563 = vmatpush1.msra.mxu0 %v381_v0  ;;  %634 = vmatpush1.msra.mxu1 %v383_v1  ;;  %v445_v0 = vld [vmem:[#allocation5 + $0x600] sm:$0xff]  ;;  %v378_v1 = vld [vmem:[#allocation2 + $0x10] sm:$0xff] }
  0x88   :  { %564 = vmatprep.subr.mxu0 %v506_v2  ;;  %635 = vmatprep.subr.mxu1 %v508_v3  ;;  %v447_v2 = vld [vmem:[#allocation5 + $0x610] sm:$0xff]  ;;  %v185_v3 = vlaneseq }
  0x89   :  { %565 = vmatpush2.msra.mxu0 %v505_v4  ;;  %636 = vmatpush2.msra.mxu1 %v507_v5 }
  0x8a   :  { %566 = vmatprep.subr.mxu0 %v502_v6  ;;  %637 = vmatprep.subr.mxu1 %v504_v7  ;;  %v915_v4 = vshrl.u32 %v185_v3, 7  ;;  %v183_v7 = vld [vmem:[#allocation7] ss:$4 sm:$0xf] }
  0x8b   :  { %567 = vmatpush2.msra.mxu0 %v501_v8  ;;  %638 = vmatpush2.msra.mxu1 %v503_v9 }
  0x8c   :  { %568 = vmatprep.subr.mxu0 %v498_v10  ;;  %639 = vmatprep.subr.mxu1 %v500_v11  ;;  %v187_v5 = vsub.s32 0, %v915_v4  ;;  %v195_v6 = vsub.s32 2, %v915_v4  ;;  %v191_v8 = vsub.s32 1, %v915_v4 }
  0x8d   :  { %569 = vmatpush2.msra.mxu0 %v497_v12  ;;  %640 = vmatpush2.msra.mxu1 %v499_v13 }
  0x8e   :  { %570 = vmatprep.subr.mxu0 %v494_v14  ;;  %641 = vmatprep.subr.mxu1 %v496_v15  ;;  %v188_v9 = vrot.slane %v183_v7, %v187_v5  ;;  %v196_v10 = vrot.slane %v183_v7, %v195_v6  ;;  %v192_v11 = vrot.slane %v183_v7, %v191_v8 }
  0x8f   :  { %571 = vmatpush2.msra.mxu0 %v493_v16  ;;  %642 = vmatpush2.msra.mxu1 %v495_v17 }
  0x90   :  { %572 = vmatprep.subr.mxu0 %v490_v18  ;;  %643 = vmatprep.subr.mxu1 %v492_v19 }
  0x91   :  { %573 = vmatpush2.msra.mxu0 %v489_v20  ;;  %644 = vmatpush2.msra.mxu1 %v491_v21  ;;  %v199_v21 = vsub.s32 3, %v915_v4 }
  0x92   :  { %574 = vmatprep.subr.mxu0 %v486_v22  ;;  %645 = vmatprep.subr.mxu1 %v488_v23 }
  0x93   :  { %575 = vmatpush2.msra.mxu0 %v485_v24  ;;  %646 = vmatpush2.msra.mxu1 %v487_v25  ;;  %v200_v22 = vrot.slane %v183_v7, %v199_v21 }
  0x94   :  { %576 = vmatprep.subr.mxu0 %v482_v26  ;;  %647 = vmatprep.subr.mxu1 %v484_v27 }
  0x95   :  { %577 = vmatpush2.msra.mxu0 %v481_v28  ;;  %648 = vmatpush2.msra.mxu1 %v483_v29 }
  0x96   :  { %578 = vmatprep.subr.mxu0 %v478_v30  ;;  %649 = vmatprep.subr.mxu1 %v480_v31 }
  0x97   :  { %579 = vmatpush2.msra.mxu0 %v477_v32  ;;  %650 = vmatpush2.msra.mxu1 %v479_v33 }
  0x98   :  { %580 = vmatprep.subr.mxu0 %v474_v34  ;;  %651 = vmatprep.subr.mxu1 %v476_v35 }
  0x99   :  { %581 = vmatpush2.msra.mxu0 %v473_v36  ;;  %652 = vmatpush2.msra.mxu1 %v475_v37  ;;  %v54_v36 = vld [vmem:[#allocation2 + $0x18] sm:$0xff] }
  0x9a   :  { %582 = vmatprep.subr.mxu0 %v470_v38  ;;  %653 = vmatprep.subr.mxu1 %v472_v39 }
  0x9b   :  { %583 = vmatpush2.msra.mxu0 %v469_v40  ;;  %654 = vmatpush2.msra.mxu1 %v471_v41 }
  0x9c   :  { %584 = vmatprep.subr.mxu0 %v466_v42  ;;  %655 = vmatprep.subr.mxu1 %v468_v43 }
  0x9d   :  { %585 = vmatpush2.msra.mxu0 %v465_v44  ;;  %656 = vmatpush2.msra.mxu1 %v467_v45 }
  0x9e   :  { %586 = vmatprep.subr.mxu0 %v462_v46  ;;  %657 = vmatprep.subr.mxu1 %v464_v47  ;;  %v510_v46 = vld [vmem:[#allocation7 + $0x1] ss:$4 sm:$0xf] }
  0x9f   :  { %587 = vmatpush2.msra.mxu0 %v461_v48  ;;  %658 = vmatpush2.msra.mxu1 %v463_v49  ;;  %v515_v47 = vrot.slane %v510_v46, %v187_v5  ;;  %v523_v48 = vrot.slane %v510_v46, %v195_v6  ;;  %v519_v49 = vrot.slane %v510_v46, %v191_v8 }
  0xa0   :  { %588 = vmatprep.subr.mxu0 %v458_v50  ;;  %659 = vmatprep.subr.mxu1 %v460_v51 }
  0xa1   :  { %589 = vmatpush2.msra.mxu0 %v457_v52  ;;  %660 = vmatpush2.msra.mxu1 %v459_v53 }
  0xa2   :  { %590 = vmatprep.subr.mxu0 %v454_v54  ;;  %661 = vmatprep.subr.mxu1 %v456_v55 }
  0xa3   :  { %591 = vmatpush2.msra.mxu0 %v453_v56  ;;  %662 = vmatpush2.msra.mxu1 %v455_v57 }
  0xa4   :  { %592 = vmatprep.subr.mxu0 %v450_v58  ;;  %663 = vmatprep.subr.mxu1 %v452_v59  ;;  %v527_v59 = vrot.slane %v510_v46, %v199_v21  ;;  %v751_v21 = vld [vmem:[#allocation7 + $0x3] ss:$0 sm:$0xff] }
  0xa5   :  { %593 = vmatpush2.msra.mxu0 %v449_v60  ;;  %664 = vmatpush2.msra.mxu1 %v451_v61 }
  0xa6   :  { %594 = vmatprep.subr.mxu0 %v446_v62  ;;  %665 = vmatprep.subr.mxu1 %v448_v63 }
  0xa7   :  { %595 = vmatpush2.msra.mxu0 %v445_v0  ;;  %596 = vmatprep.mubr.f32.mxu0 %v378_v1 }
  0xa8   :  { %666 = vmatpush2.msra.mxu1 %v447_v2  ;;  %667 = vmatprep.mubr.f32.mxu1 %v378_v1 }
 0x127   :  { %v271_v12 = vpop.f32.mrf.mxu0  ;;  %v342_v13 = vpop.f32.mrf.mxu1 }
 0x128   :  { %v272_v14 = vadd.f32 %v271_v12, %v188_v9  ;;  %v343_v15 = vadd.f32 %v342_v13, %v196_v10  ;;  %v379_v9 = vld [vmem:[#allocation2 + $0x20] sm:$0xff] }
 0x129   :  { %v273_v16 = vpop.f32.mrf.mxu0  ;;  %v344_v23 = vpop.f32.mrf.mxu1 }
 0x12a   :  { %v740_v17 = vmul.f32 -1.442695, %v272_v14  ;;  %v742_v18 = vmul.f32 -1.442695, %v343_v15  ;;  %v274_v19 = vadd.f32 %v273_v16, %v192_v11  ;;  %v345_v24 = vadd.f32 %v344_v23, %v200_v22 }
 0x12c   :  { %758 = vpow2.f32 %v740_v17  ;;  %v741_v20 = vmul.f32 -1.442695, %v274_v19  ;;  %v743_v27 = vmul.f32 -1.442695, %v345_v24 }
 0x12d   :  { %760 = vpow2.f32 %v742_v18  ;;  %v750_v18 = vld [vmem:[#allocation7 + $0x2] ss:$0 sm:$0xff] }
 0x12e   :  { %762 = vpow2.f32 %v741_v20 }
 0x139   :  { %v759_v25 = vpop.eup %758 }
 0x13a   :  { %v761_v26 = vpop.eup %760  ;;  %v359_v31 = vadd.f32 1.0, %v759_v25 }
 0x13b   :  { %v763_v28 = vpop.eup %762  ;;  %v361_v29 = vadd.f32 1.0, %v761_v26 }
 0x13c   :  { %v360_v30 = vadd.f32 1.0, %v763_v28 }
 0x13d   :  { %764 = vrcp.f32 %v361_v29 }
 0x13e   :  { %766 = vpow2.f32 %v743_v27 }
 0x13f   :  { %768 = vrcp.f32 %v360_v30 }
 0x140   :  { %770 = vrcp.f32 %v359_v31 }
 0x14a   :  { %v765_v32 = vpop.eup %764 }
 0x14b   :  { %v767_v33 = vpop.eup %766  ;;  %v371_v34 = vmul.f32 2.0, %v765_v32 }
 0x14c   :  { %v769_v35 = vpop.eup %768  ;;  %v362_v39 = vadd.f32 1.0, %v767_v33 }
 0x14d   :  { %v744_v37 = vadd.f32 -1.0, %v371_v34  ;;  %v771_v38 = vpop.eup %770  ;;  %v373_v41 = vmul.f32 %v769_v35, %v54_v36 }
 0x14e   :  { %772 = vrcp.f32 %v362_v39 }
 0x14f   :  { %v374_v40 = vmul.f32 %v771_v38, %v744_v37 }
 0x151   :  { %v375_v42 = vadd.f32 %v374_v40, %v373_v41 }
 0x153   :  { %716 = vst [vmem:[#allocation8 + $0x10] sm:$0xff] %v375_v42  ;;  %774 = vtanh.f32 %v375_v42 }
 0x15b   :  { %v773_v43 = vpop.eup %772 }
 0x160   :  { %v775_v44 = vpop.eup %774 }
 0x161   :  { %v377_v45 = vmul.f32 %v775_v44, %v773_v43 }
 0x163   :  { %597 = vmatmul.mubr.f32.vlgmr.msra.gmra.mxu0 %v377_v45  ;;  %714 = vst [vmem:[#allocation8] sm:$0xff] %v377_v45  ;;  %668 = vmatmul.mubr.f32.vlgmr.msra.gmra.mxu1 %v377_v45 }
 0x223   :  { %v598_v50 = vpop.f32.mrf.mxu0  ;;  %v669_v51 = vpop.f32.mrf.mxu1 }
 0x224   :  { %v599_v52 = vadd.f32 %v598_v50, %v515_v47  ;;  %v670_v53 = vadd.f32 %v669_v51, %v523_v48 }
 0x225   :  { %v600_v54 = vpop.f32.mrf.mxu0  ;;  %v671_v60 = vpop.f32.mrf.mxu1 }
 0x226   :  { %v745_v55 = vmul.f32 -1.442695, %v599_v52  ;;  %v747_v56 = vmul.f32 -1.442695, %v670_v53  ;;  %v601_v57 = vadd.f32 %v600_v54, %v519_v49  ;;  %v672_v61 = vadd.f32 %v671_v60, %v527_v59 }
 0x228   :  { %776 = vpow2.f32 %v745_v55  ;;  %v746_v58 = vmul.f32 -1.442695, %v601_v57  ;;  %v748_v0 = vmul.f32 -1.442695, %v672_v61 }
 0x229   :  { %778 = vpow2.f32 %v747_v56 }
 0x22a   :  { %780 = vpow2.f32 %v746_v58 }
 0x235   :  { %v777_v62 = vpop.eup %776 }
 0x236   :  { %v779_v63 = vpop.eup %778  ;;  %v686_v4 = vadd.f32 1.0, %v777_v62 }
 0x237   :  { %v781_v1 = vpop.eup %780  ;;  %v688_v2 = vadd.f32 1.0, %v779_v63 }
 0x238   :  { %v687_v3 = vadd.f32 1.0, %v781_v1 }
 0x239   :  { %782 = vrcp.f32 %v688_v2 }
 0x23a   :  { %784 = vpow2.f32 %v748_v0 }
 0x23b   :  { %786 = vrcp.f32 %v687_v3 }
 0x23c   :  { %788 = vrcp.f32 %v686_v4 }
 0x246   :  { %v783_v5 = vpop.eup %782 }
 0x247   :  { %v785_v6 = vpop.eup %784  ;;  %v698_v7 = vmul.f32 2.0, %v783_v5 }
 0x248   :  { %v787_v8 = vpop.eup %786  ;;  %v689_v12 = vadd.f32 1.0, %v785_v6 }
 0x249   :  { %v749_v10 = vadd.f32 -1.0, %v698_v7  ;;  %v789_v11 = vpop.eup %788  ;;  %v700_v14 = vmul.f32 %v787_v8, %v379_v9 }
 0x24a   :  { %790 = vrcp.f32 %v689_v12 }
 0x24b   :  { %v701_v13 = vmul.f32 %v789_v11, %v749_v10 }
 0x24d   :  { %v702_v15 = vadd.f32 %v701_v13, %v700_v14 }
 0x24f   :  { %792 = vtanh.f32 %v702_v15  ;;  %717 = vst [vmem:[#allocation8 + $0x18] sm:$0xff] %v702_v15 }
 0x257   :  { %v791_v16 = vpop.eup %790 }
 0x25c   :  { %v793_v17 = vpop.eup %792 }
 0x25d   :  { %v704_v19 = vmul.f32 %v793_v17, %v791_v16 }
 0x25f   :  { %v711_v20 = vmul.f32 %v750_v18, %v704_v19  ;;  %715 = vst [vmem:[#allocation8 + $0x8] sm:$0xff] %v704_v19 }
 0x261   :  { %712 = vadd.xlane.f32.xlu0 %v711_v20 }
 0x2ea   :  { %v713_v22 = vpop.xlane.xlu0 %712 }
 0x2eb   :  { %v722_v23 = vadd.f32 %v751_v21, %v713_v22 }
 0x2ed   :  { %723 = vst [vmem:[#allocation8 + $0x20] sm:$0xff] %v722_v23 }
 0x2ee   :  { %865 = shalt.err (!%p862_p5)
}
 0x2ef   :  { %733 = dma.vmem_to_hbm [thread:$0]  %s731_s2, 640, %s927_s3, [#allocation4]  }
 0x2f0   :  { %878 = dma.done.wait [#allocation4], 640  }
 0x2f1   :  { %879 = vsyncadd [#allocation4], 4294966656 }
 0x2f2   :  { %737 = vsyncpa [#allocation3], 1 }
 0x2f3   :  { %738 = vsyncpa [#allocation6], 1 }
 0x2f4   :  { %739 = vsyncpa [#allocation4], 1 }

</bundles_post_ra>
